<compile_context>
chip_gen: v5e
topology: v5e:2x2
jax: 0.10.0
libtpu: 0.0.40
codegen_flags: <defaults>
</compile_context>

<pallas_src>
import jax
import jax.numpy as jnp
from jax.experimental import pallas as pl
from jax.experimental.pallas import tpu as pltpu

LANE = 128


def _round_up(x, m):
    return ((x + m - 1) // m) * m


def _cdiv(a, b):
    return (a + b - 1) // b


def _vmem_capacity_bytes():
    """Physical VMEM per TensorCore; conservative fallback if unqueryable."""
    try:
        info = pltpu.get_tpu_info()
        cap = getattr(info, "vmem_capacity_bytes", None)
        if cap:
            return int(cap)
    except Exception:
        pass
    return 64 << 20  # v7x-sized conservative default


# ---------------------------------------------------------------------------
# Pallas kernels: fused feature construction + 3-layer tanh MLP classifier
# ---------------------------------------------------------------------------
def _mlp_tail(z1_f32, b1, w2_ref, b2_ref, w3_ref, b3_ref, out_ref):
    h1 = jnp.tanh(z1_f32 + b1)
    h2 = jnp.tanh(
        jnp.dot(h1.astype(jnp.bfloat16), w2_ref[...],
                preferred_element_type=jnp.float32) + b2_ref[...])
    logits = (jnp.dot(h2.astype(jnp.bfloat16), w3_ref[...],
                      preferred_element_type=jnp.float32) + b3_ref[...])
    out_ref[...] = logits.astype(out_ref.dtype)


def shared_nli_kernel_split(u_ref, v_ref,
                            w1a_ref, w1b_ref, w1c_ref, w1d_ref, b1_ref,
                            w2_ref, b2_ref, w3_ref, b3_ref, out_ref):
    # Used when 2H >= 128: four full-depth dots, no lane-axis concat, and the
    # feature chunks stay bf16 (small live temporaries).
    ub = u_ref[...]                      # (TB, 2H) bf16
    vb = v_ref[...]
    db = jnp.abs(ub - vb)
    pb = ub * vb
    z1 = jnp.dot(ub, w1a_ref[...], preferred_element_type=jnp.float32)
    z1 = z1 + jnp.dot(vb, w1b_ref[...], preferred_element_type=jnp.float32)
    z1 = z1 + jnp.dot(db, w1c_ref[...], preferred_element_type=jnp.float32)
    z1 = z1 + jnp.dot(pb, w1d_ref[...], preferred_element_type=jnp.float32)
    _mlp_tail(z1, b1_ref[...], w2_ref, b2_ref, w3_ref, b3_ref, out_ref)


def shared_nli_kernel_packed(u_ref, v_ref,
                             w1_ref, b1_ref,
                             w2_ref, b2_ref, w3_ref, b3_ref, out_ref):
    # Used when 2H < 128: pack the four feature chunks into one (TB, 4*2H)
    # operand so W1 is contracted with a single full-depth MXU dot instead of
    # four shallow K=2H dots.  Temps are tiny here (K_total = 4*2H <= 512).
    u = u_ref[...].astype(jnp.float32)
    v = v_ref[...].astype(jnp.float32)
    feats = jnp.concatenate([u, v, jnp.abs(u - v), u * v], axis=1)
    z1 = jnp.dot(feats.astype(jnp.bfloat16), w1_ref[...],
                 preferred_element_type=jnp.float32)
    _mlp_tail(z1, b1_ref[...], w2_ref, b2_ref, w3_ref, b3_ref, out_ref)


# ---------------------------------------------------------------------------
# Wrapper
# ---------------------------------------------------------------------------
def shared_nli_classifier(u, v, params, *, batch_tile=None):
    """SharedNLINet feature construction + classifier on TPU via Pallas."""
    w1, b1, w2, b2, w3, b3 = params
    B, two_h = u.shape
    inputdim, fc_dim = w1.shape
    n_classes = w3.shape[1]
    assert inputdim == 4 * two_h, "inputdim must be 4 * 2 * enc_lstm_dim"

    vmem_cap = _vmem_capacity_bytes()
    if batch_tile is None:
        # Bigger tiles on 128-MiB-VMEM chips (v5e/v6e), 256 on v7x.
        batch_tile = 512 if vmem_cap >= (96 << 20) else 256

    # Lane-dense padding of hidden / class dims (zero pads exact: tanh(0)=0).
    fcp = _round_up(fc_dim, LANE)
    ncp = _round_up(n_classes, LANE)

    def pad2(a, rows, cols):
        return jnp.pad(a, ((0, rows - a.shape[0]), (0, cols - a.shape[1])))

    b1p = pad2(b1, 1, fcp)                                   # biases stay f32
    w2p = pad2(w2, fcp, fcp).astype(jnp.bfloat16)
    b2p = pad2(b2, 1, fcp)
    w3p = pad2(w3, fcp, ncp).astype(jnp.bfloat16)
    b3p = pad2(b3, 1, ncp)
    w1p = pad2(w1, inputdim, fcp).astype(jnp.bfloat16)

    split_w1 = two_h >= LANE
    if split_w1:
        # W1 row-blocks matching (u, v, |u-v|, u*v) -> no in-kernel concat.
        w_args = [w1p[0 * two_h:1 * two_h], w1p[1 * two_h:2 * two_h],
                  w1p[2 * two_h:3 * two_h], w1p[3 * two_h:4 * two_h],
                  b1p, w2p, b2p, w3p, b3p]
        kernel = shared_nli_kernel_split
    else:
        w_args = [w1p, b1p, w2p, b2p, w3p, b3p]
        kernel = shared_nli_kernel_packed
    w_shapes = [tuple(a.shape) for a in w_args]
    weight_bytes = sum(int(a.size) * a.dtype.itemsize for a in w_args)

    # Batch tiling: always >= 2 grid steps (DMA/compute overlap + v7x 2-TC
    # split), minimal padding, sublane-aligned tiles.
    n_tiles = max(2, _cdiv(B, batch_tile))
    tb = _round_up(_cdiv(B, n_tiles), 8)
    bp = n_tiles * tb
    grid = (n_tiles,)

    # Stream u/v as bf16 (half the per-step DMA bytes).
    ub = u.astype(jnp.bfloat16)
    vb = v.astype(jnp.bfloat16)
    if bp != B:
        ub = jnp.pad(ub, ((0, bp - B), (0, 0)))
        vb = jnp.pad(vb, ((0, bp - B), (0, 0)))

    row_spec = pl.BlockSpec((tb, two_h), lambda i: (i, 0))
    out_spec = pl.BlockSpec((tb, ncp), lambda i: (i, 0))

    cost = pl.CostEstimate(
        flops=2 * bp * (inputdim * fcp + fcp * fcp + fcp * ncp),
        transcendentals=2 * bp * fcp,
        bytes_accessed=2 * bp * two_h * 2 + weight_bytes + bp * ncp * 4,
    )
    out_shape = jax.ShapeDtypeStruct((bp, ncp), jnp.float32)

    def build(single_buffer_weights):
        def const_spec(shape):
            if single_buffer_weights:
                # Constant index_map -> no pipelining needed; keep one copy.
                return pl.BlockSpec(shape, lambda i: (0, 0),
                                    pipeline_mode=pl.Buffered(1))
            return pl.BlockSpec(shape, lambda i: (0, 0))

        w_mult = 1 if single_buffer_weights else 2
        # Streamed tiles are double-buffered; headroom covers the in-kernel
        # bf16/f32 temporaries (features, z1/h1/h2, logits) + compiler scratch.
        tile_bytes = 2 * (2 * tb * two_h * 2 + tb * ncp * 4)
        temp_bytes = tb * (4 * two_h * 2 + 3 * fcp * 4 + ncp * 4)
        needed = w_mult * weight_bytes + tile_bytes + temp_bytes + (8 << 20)
        vmem_limit = int(min(max(needed, 32 << 20), int(vmem_cap * 0.8)))

        return pl.pallas_call(
            kernel,
            out_shape=out_shape,
            grid=grid,
            in_specs=[row_spec, row_spec] + [const_spec(s) for s in w_shapes],
            out_specs=out_spec,
            compiler_params=pltpu.CompilerParams(
                dimension_semantics=("parallel",),
                vmem_limit_bytes=vmem_limit),
            cost_estimate=cost,
        )

    try:
        out = build(True)(ub, vb, *w_args)
    except Exception:
        # Fallback for JAX builds without pl.Buffered / pipeline_mode support.
        out = build(False)(ub, vb, *w_args)

    return out[:B, :n_classes]


# ---------------------------------------------------------------------------
# Glue: deterministic stand-in encoders + full forward
# ---------------------------------------------------------------------------
def make_params(key, word_dim, enc_lstm_dim, fc_dim, n_classes):
    ks = jax.random.split(key, 8)
    enc_out = 2 * enc_lstm_dim
    inputdim = 4 * enc_out                      # 4 * 2 * enc_lstm_dim
    scale = 0.1
    enc_p = scale * jax.random.normal(ks[0], (word_dim, enc_out), jnp.float32)
    enc_h = scale * jax.random.normal(ks[1], (word_dim, enc_out), jnp.float32)
    w1 = scale * jax.random.normal(ks[2], (inputdim, fc_dim), jnp.float32)
    b1 = scale * jax.random.normal(ks[3], (1, fc_dim), jnp.float32)
    w2 = scale * jax.random.normal(ks[4], (fc_dim, fc_dim), jnp.float32)
    b2 = scale * jax.random.normal(ks[5], (1, fc_dim), jnp.float32)
    w3 = scale * jax.random.normal(ks[6], (fc_dim, n_classes), jnp.float32)
    b3 = scale * jax.random.normal(ks[7], (1, n_classes), jnp.float32)
    return enc_p, enc_h, (w1, b1, w2, b2, w3, b3)


def stand_in_encoder(s, enc_w):
    # s: (seq, batch, word_dim) -- mean pool over seq, project, relu.
    pooled = jnp.mean(s, axis=0)                # (batch, word_dim)
    return jax.nn.relu(pooled @ enc_w)          # (batch, 2*enc_lstm_dim)


def shared_nli_forward(s1, s2, enc_p, enc_h, clf_params, random_premise=False):
    u = stand_in_encoder(s1, enc_p)
    v = stand_in_encoder(s2, enc_h)
    if random_premise:
        # grad_reverse is identity in the forward pass (only flips gradients).
        pass
    return shared_nli_classifier(u, v, clf_params)


# Pure-JAX reference matching the kernel's precision contract
# (bf16 feature math / matmul operands, f32 accumulation, f32 bias + tanh).
def reference_forward(s1, s2, enc_p, enc_h, clf_params):
    u = stand_in_encoder(s1, enc_p)
    v = stand_in_encoder(s2, enc_h)
    ub = u.astype(jnp.bfloat16)
    vb = v.astype(jnp.bfloat16)
    feats = jnp.concatenate([ub, vb, jnp.abs(ub - vb), ub * vb], axis=1)
    w1, b1, w2, b2, w3, b3 = clf_params

    def mm(x, w):
        return jnp.dot(x.astype(jnp.bfloat16), w.astype(jnp.bfloat16),
                       preferred_element_type=jnp.float32)

    h1 = jnp.tanh(mm(feats, w1) + b1)
    h2 = jnp.tanh(mm(h1, w2) + b2)
    return mm(h2, w3) + b3


if __name__ == "__main__":
    # Small config consistent with the module.
    B = 8               # batch
    SEQ = 8             # sequence length
    WORD_DIM = 32       # word embedding dim (encoder input)
    ENC_LSTM_DIM = 16   # config['enc_lstm_dim'] -> encoder output = 32
    FC_DIM = 64         # config['fc_dim']
    N_CLASSES = 3       # config['n_classes']
    # nonlinear_fc=True, dropout=0 (inference), encoder_type not in
    # {ConvNetEncoder, InnerAttentionMILAEncoder, LSTMEncoder} -> inputdim = 128

    key = jax.random.PRNGKey(0)
    kp, ks1, ks2 = jax.random.split(key, 3)
    enc_p, enc_h, clf_params = make_params(kp, WORD_DIM, ENC_LSTM_DIM,
                                           FC_DIM, N_CLASSES)

    s1 = jax.random.normal(ks1, (SEQ, B, WORD_DIM), jnp.float32)
    s2 = jax.random.normal(ks2, (SEQ, B, WORD_DIM), jnp.float32)

    out = shared_nli_forward(s1, s2, enc_p, enc_h, clf_params,
                             random_premise=True)
    out = jax.block_until_ready(out)

    ref = reference_forward(s1, s2, enc_p, enc_h, clf_params)
    assert out.shape == (B, N_CLASSES)
    assert jnp.allclose(out, ref, atol=5e-3, rtol=5e-3), "mismatch vs reference"

    print("KERNEL_OK")
</pallas_src>

<mosaic_0001>
module attributes {stable_mosaic.version = 11 : i64} {
  func.func @shared_nli_kernel_packed(%arg0: i32, %arg1: memref<8x32xbf16, #tpu.memory_space<vmem>>, %arg2: memref<8x32xbf16, #tpu.memory_space<vmem>>, %arg3: memref<128x128xbf16, #tpu.memory_space<vmem>>, %arg4: memref<1x128xf32, #tpu.memory_space<vmem>>, %arg5: memref<128x128xbf16, #tpu.memory_space<vmem>>, %arg6: memref<1x128xf32, #tpu.memory_space<vmem>>, %arg7: memref<128x128xbf16, #tpu.memory_space<vmem>>, %arg8: memref<1x128xf32, #tpu.memory_space<vmem>>, %arg9: memref<8x128xf32, #tpu.memory_space<vmem>>) attributes {dimension_semantics = [#tpu.dimension_semantics<parallel>], iteration_bounds = array<i64: 2>, scalar_prefetch = 0 : i64, scratch_operands = 0 : i64, tpu.core_type = #tpu.core_type<tc>, window_params = [{transform_indices = @transform_0, window_bounds = array<i64: 8, 32>}, {transform_indices = @transform_1, window_bounds = array<i64: 8, 32>}, {pipeline_mode = #tpu.pipeline_mode<synchronous>, transform_indices = @transform_2, window_bounds = array<i64: 128, 128>}, {pipeline_mode = #tpu.pipeline_mode<synchronous>, transform_indices = @transform_3, window_bounds = array<i64: 1, 128>}, {pipeline_mode = #tpu.pipeline_mode<synchronous>, transform_indices = @transform_4, window_bounds = array<i64: 128, 128>}, {pipeline_mode = #tpu.pipeline_mode<synchronous>, transform_indices = @transform_5, window_bounds = array<i64: 1, 128>}, {pipeline_mode = #tpu.pipeline_mode<synchronous>, transform_indices = @transform_6, window_bounds = array<i64: 128, 128>}, {pipeline_mode = #tpu.pipeline_mode<synchronous>, transform_indices = @transform_7, window_bounds = array<i64: 1, 128>}, {transform_indices = @transform_8, window_bounds = array<i64: 8, 128>}]} {
    %c0 = arith.constant 0 : index
    %c0_0 = arith.constant 0 : index
    %0 = vector.load %arg1[%c0, %c0_0] : memref<8x32xbf16, #tpu.memory_space<vmem>>, vector<8x32xbf16>
    %1 = arith.extf %0 : vector<8x32xbf16> to vector<8x32xf32>
    %c0_1 = arith.constant 0 : index
    %c0_2 = arith.constant 0 : index
    %2 = vector.load %arg2[%c0_1, %c0_2] : memref<8x32xbf16, #tpu.memory_space<vmem>>, vector<8x32xbf16>
    %3 = arith.extf %2 : vector<8x32xbf16> to vector<8x32xf32>
    %4 = arith.subf %1, %3 : vector<8x32xf32>
    %5 = math.absf %4 : vector<8x32xf32>
    %6 = arith.mulf %1, %3 : vector<8x32xf32>
    %7 = tpu.concatenate %1, %3, %5, %6 in 1 : vector<8x32xf32>, vector<8x32xf32>, vector<8x32xf32>, vector<8x32xf32> -> vector<8x128xf32>
    %8 = arith.truncf %7 : vector<8x128xf32> to vector<8x128xbf16>
    %c0_3 = arith.constant 0 : index
    %c0_4 = arith.constant 0 : index
    %9 = vector.load %arg3[%c0_3, %c0_4] : memref<128x128xbf16, #tpu.memory_space<vmem>>, vector<128x128xbf16>
    %cst = arith.constant dense<0.000000e+00> : vector<8x128xf32>
    %10 = tpu.matmul %8, %9, %cst {dimension_numbers = #tpu.dot_dimension_numbers<[1], [0], [0], [1], [0, 0, 1, 1], [], []>} : vector<8x128xbf16>, vector<128x128xbf16>, vector<8x128xf32> -> vector<8x128xf32>
    %c0_5 = arith.constant 0 : index
    %c0_6 = arith.constant 0 : index
    %11 = vector.load %arg4[%c0_5, %c0_6] : memref<1x128xf32, #tpu.memory_space<vmem>>, vector<1x128xf32>
    %12 = vector.broadcast %11 : vector<1x128xf32> to vector<8x128xf32>
    %13 = arith.addf %10, %12 : vector<8x128xf32>
    %14 = math.tanh %13 : vector<8x128xf32>
    %15 = arith.truncf %14 : vector<8x128xf32> to vector<8x128xbf16>
    %c0_7 = arith.constant 0 : index
    %c0_8 = arith.constant 0 : index
    %16 = vector.load %arg5[%c0_7, %c0_8] : memref<128x128xbf16, #tpu.memory_space<vmem>>, vector<128x128xbf16>
    %cst_9 = arith.constant dense<0.000000e+00> : vector<8x128xf32>
    %17 = tpu.matmul %15, %16, %cst_9 {dimension_numbers = #tpu.dot_dimension_numbers<[1], [0], [0], [1], [0, 0, 1, 1], [], []>} : vector<8x128xbf16>, vector<128x128xbf16>, vector<8x128xf32> -> vector<8x128xf32>
    %c0_10 = arith.constant 0 : index
    %c0_11 = arith.constant 0 : index
    %18 = vector.load %arg6[%c0_10, %c0_11] : memref<1x128xf32, #tpu.memory_space<vmem>>, vector<1x128xf32>
    %19 = vector.broadcast %18 : vector<1x128xf32> to vector<8x128xf32>
    %20 = arith.addf %17, %19 : vector<8x128xf32>
    %21 = math.tanh %20 : vector<8x128xf32>
    %22 = arith.truncf %21 : vector<8x128xf32> to vector<8x128xbf16>
    %c0_12 = arith.constant 0 : index
    %c0_13 = arith.constant 0 : index
    %23 = vector.load %arg7[%c0_12, %c0_13] : memref<128x128xbf16, #tpu.memory_space<vmem>>, vector<128x128xbf16>
    %cst_14 = arith.constant dense<0.000000e+00> : vector<8x128xf32>
    %24 = tpu.matmul %22, %23, %cst_14 {dimension_numbers = #tpu.dot_dimension_numbers<[1], [0], [0], [1], [0, 0, 1, 1], [], []>} : vector<8x128xbf16>, vector<128x128xbf16>, vector<8x128xf32> -> vector<8x128xf32>
    %c0_15 = arith.constant 0 : index
    %c0_16 = arith.constant 0 : index
    %25 = vector.load %arg8[%c0_15, %c0_16] : memref<1x128xf32, #tpu.memory_space<vmem>>, vector<1x128xf32>
    %26 = vector.broadcast %25 : vector<1x128xf32> to vector<8x128xf32>
    %27 = arith.addf %24, %26 : vector<8x128xf32>
    %c0_17 = arith.constant 0 : index
    %c0_18 = arith.constant 0 : index
    %28 = vector.load %arg9[%c0_17, %c0_18] : memref<8x128xf32, #tpu.memory_space<vmem>>, vector<8x128xf32>
    tpu.vector_store %arg9[%c0_17, %c0_18], %27 {strides = array<i32>} : memref<8x128xf32, #tpu.memory_space<vmem>>, vector<8x128xf32>,
    return
  }
  func.func @transform_0(%arg0: i32) -> (i32, i32) {
    %c0_i32 = arith.constant 0 : i32
    %c0_i32_0 = arith.constant 0 : i32
    return %arg0, %c0_i32 : i32, i32
  }
  func.func @transform_1(%arg0: i32) -> (i32, i32) {
    %c0_i32 = arith.constant 0 : i32
    %c0_i32_0 = arith.constant 0 : i32
    return %arg0, %c0_i32 : i32, i32
  }
  func.func @transform_2(%arg0: i32) -> (i32, i32) {
    %c0_i32 = arith.constant 0 : i32
    %c0_i32_0 = arith.constant 0 : i32
    %c0_i32_1 = arith.constant 0 : i32
    return %c0_i32, %c0_i32_0 : i32, i32
  }
  func.func @transform_3(%arg0: i32) -> (i32, i32) {
    %c0_i32 = arith.constant 0 : i32
    %c0_i32_0 = arith.constant 0 : i32
    %c0_i32_1 = arith.constant 0 : i32
    return %c0_i32, %c0_i32_0 : i32, i32
  }
  func.func @transform_4(%arg0: i32) -> (i32, i32) {
    %c0_i32 = arith.constant 0 : i32
    %c0_i32_0 = arith.constant 0 : i32
    %c0_i32_1 = arith.constant 0 : i32
    return %c0_i32, %c0_i32_0 : i32, i32
  }
  func.func @transform_5(%arg0: i32) -> (i32, i32) {
    %c0_i32 = arith.constant 0 : i32
    %c0_i32_0 = arith.constant 0 : i32
    %c0_i32_1 = arith.constant 0 : i32
    return %c0_i32, %c0_i32_0 : i32, i32
  }
  func.func @transform_6(%arg0: i32) -> (i32, i32) {
    %c0_i32 = arith.constant 0 : i32
    %c0_i32_0 = arith.constant 0 : i32
    %c0_i32_1 = arith.constant 0 : i32
    return %c0_i32, %c0_i32_0 : i32, i32
  }
  func.func @transform_7(%arg0: i32) -> (i32, i32) {
    %c0_i32 = arith.constant 0 : i32
    %c0_i32_0 = arith.constant 0 : i32
    %c0_i32_1 = arith.constant 0 : i32
    return %c0_i32, %c0_i32_0 : i32, i32
  }
  func.func @transform_8(%arg0: i32) -> (i32, i32) {
    %c0_i32 = arith.constant 0 : i32
    %c0_i32_0 = arith.constant 0 : i32
    return %arg0, %c0_i32 : i32, i32
  }
}

module attributes {stable_mosaic.version = 11 : i64} {
  func.func @shared_nli_kernel_packed(%arg0: i32, %arg1: memref<8x32xbf16, #tpu.memory_space<vmem>>, %arg2: memref<8x32xbf16, #tpu.memory_space<vmem>>, %arg3: memref<128x128xbf16, #tpu.memory_space<vmem>>, %arg4: memref<1x128xf32, #tpu.memory_space<vmem>>, %arg5: memref<128x128xbf16, #tpu.memory_space<vmem>>, %arg6: memref<1x128xf32, #tpu.memory_space<vmem>>, %arg7: memref<128x128xbf16, #tpu.memory_space<vmem>>, %arg8: memref<1x128xf32, #tpu.memory_space<vmem>>, %arg9: memref<8x128xf32, #tpu.memory_space<vmem>>) attributes {dimension_semantics = [#tpu.dimension_semantics<parallel>], iteration_bounds = array<i64: 2>, scalar_prefetch = 0 : i64, scratch_operands = 0 : i64, tpu.core_type = #tpu.core_type<tc>, window_params = [{transform_indices = @transform_0, window_bounds = array<i64: 8, 32>}, {transform_indices = @transform_1, window_bounds = array<i64: 8, 32>}, {pipeline_mode = #tpu.pipeline_mode<synchronous>, transform_indices = @transform_2, window_bounds = array<i64: 128, 128>}, {pipeline_mode = #tpu.pipeline_mode<synchronous>, transform_indices = @transform_3, window_bounds = array<i64: 1, 128>}, {pipeline_mode = #tpu.pipeline_mode<synchronous>, transform_indices = @transform_4, window_bounds = array<i64: 128, 128>}, {pipeline_mode = #tpu.pipeline_mode<synchronous>, transform_indices = @transform_5, window_bounds = array<i64: 1, 128>}, {pipeline_mode = #tpu.pipeline_mode<synchronous>, transform_indices = @transform_6, window_bounds = array<i64: 128, 128>}, {pipeline_mode = #tpu.pipeline_mode<synchronous>, transform_indices = @transform_7, window_bounds = array<i64: 1, 128>}, {transform_indices = @transform_8, window_bounds = array<i64: 8, 128>}]} {
    %c0 = arith.constant 0 : index
    %c0_0 = arith.constant 0 : index
    %0 = vector.load %arg1[%c0, %c0_0] : memref<8x32xbf16, #tpu.memory_space<vmem>>, vector<8x32xbf16>
    %1 = arith.extf %0 : vector<8x32xbf16> to vector<8x32xf32>
    %c0_1 = arith.constant 0 : index
    %c0_2 = arith.constant 0 : index
    %2 = vector.load %arg2[%c0_1, %c0_2] : memref<8x32xbf16, #tpu.memory_space<vmem>>, vector<8x32xbf16>
    %3 = arith.extf %2 : vector<8x32xbf16> to vector<8x32xf32>
    %4 = arith.subf %1, %3 : vector<8x32xf32>
    %5 = math.absf %4 : vector<8x32xf32>
    %6 = arith.mulf %1, %3 : vector<8x32xf32>
    %7 = tpu.concatenate %1, %3, %5, %6 in 1 : vector<8x32xf32>, vector<8x32xf32>, vector<8x32xf32>, vector<8x32xf32> -> vector<8x128xf32>
    %8 = arith.truncf %7 : vector<8x128xf32> to vector<8x128xbf16>
    %c0_3 = arith.constant 0 : index
    %c0_4 = arith.constant 0 : index
    %9 = vector.load %arg3[%c0_3, %c0_4] : memref<128x128xbf16, #tpu.memory_space<vmem>>, vector<128x128xbf16>
    %cst = arith.constant dense<0.000000e+00> : vector<8x128xf32>
    %10 = tpu.matmul %8, %9, %cst {dimension_numbers = #tpu.dot_dimension_numbers<[1], [0], [0], [1], [0, 0, 1, 1], [], []>} : vector<8x128xbf16>, vector<128x128xbf16>, vector<8x128xf32> -> vector<8x128xf32>
    %c0_5 = arith.constant 0 : index
    %c0_6 = arith.constant 0 : index
    %11 = vector.load %arg4[%c0_5, %c0_6] : memref<1x128xf32, #tpu.memory_space<vmem>>, vector<1x128xf32>
    %12 = vector.broadcast %11 : vector<1x128xf32> to vector<8x128xf32>
    %13 = arith.addf %10, %12 : vector<8x128xf32>
    %14 = math.tanh %13 : vector<8x128xf32>
    %15 = arith.truncf %14 : vector<8x128xf32> to vector<8x128xbf16>
    %c0_7 = arith.constant 0 : index
    %c0_8 = arith.constant 0 : index
    %16 = vector.load %arg5[%c0_7, %c0_8] : memref<128x128xbf16, #tpu.memory_space<vmem>>, vector<128x128xbf16>
    %cst_9 = arith.constant dense<0.000000e+00> : vector<8x128xf32>
    %17 = tpu.matmul %15, %16, %cst_9 {dimension_numbers = #tpu.dot_dimension_numbers<[1], [0], [0], [1], [0, 0, 1, 1], [], []>} : vector<8x128xbf16>, vector<128x128xbf16>, vector<8x128xf32> -> vector<8x128xf32>
    %c0_10 = arith.constant 0 : index
    %c0_11 = arith.constant 0 : index
    %18 = vector.load %arg6[%c0_10, %c0_11] : memref<1x128xf32, #tpu.memory_space<vmem>>, vector<1x128xf32>
    %19 = vector.broadcast %18 : vector<1x128xf32> to vector<8x128xf32>
    %20 = arith.addf %17, %19 : vector<8x128xf32>
    %21 = math.tanh %20 : vector<8x128xf32>
    %22 = arith.truncf %21 : vector<8x128xf32> to vector<8x128xbf16>
    %c0_12 = arith.constant 0 : index
    %c0_13 = arith.constant 0 : index
    %23 = vector.load %arg7[%c0_12, %c0_13] : memref<128x128xbf16, #tpu.memory_space<vmem>>, vector<128x128xbf16>
    %cst_14 = arith.constant dense<0.000000e+00> : vector<8x128xf32>
    %24 = tpu.matmul %22, %23, %cst_14 {dimension_numbers = #tpu.dot_dimension_numbers<[1], [0], [0], [1], [0, 0, 1, 1], [], []>} : vector<8x128xbf16>, vector<128x128xbf16>, vector<8x128xf32> -> vector<8x128xf32>
    %c0_15 = arith.constant 0 : index
    %c0_16 = arith.constant 0 : index
    %25 = vector.load %arg8[%c0_15, %c0_16] : memref<1x128xf32, #tpu.memory_space<vmem>>, vector<1x128xf32>
    %26 = vector.broadcast %25 : vector<1x128xf32> to vector<8x128xf32>
    %27 = arith.addf %24, %26 : vector<8x128xf32>
    %c0_17 = arith.constant 0 : index
    %c0_18 = arith.constant 0 : index
    %28 = vector.load %arg9[%c0_17, %c0_18] : memref<8x128xf32, #tpu.memory_space<vmem>>, vector<8x128xf32>
    tpu.vector_store %arg9[%c0_17, %c0_18], %27 {strides = array<i32>} : memref<8x128xf32, #tpu.memory_space<vmem>>, vector<8x128xf32>,
    return
  }
  func.func @transform_0(%arg0: i32) -> (i32, i32) {
    %c0_i32 = arith.constant 0 : i32
    %c0_i32_0 = arith.constant 0 : i32
    return %arg0, %c0_i32 : i32, i32
  }
  func.func @transform_1(%arg0: i32) -> (i32, i32) {
    %c0_i32 = arith.constant 0 : i32
    %c0_i32_0 = arith.constant 0 : i32
    return %arg0, %c0_i32 : i32, i32
  }
  func.func @transform_2(%arg0: i32) -> (i32, i32) {
    %c0_i32 = arith.constant 0 : i32
    %c0_i32_0 = arith.constant 0 : i32
    %c0_i32_1 = arith.constant 0 : i32
    return %c0_i32, %c0_i32_0 : i32, i32
  }
  func.func @transform_3(%arg0: i32) -> (i32, i32) {
    %c0_i32 = arith.constant 0 : i32
    %c0_i32_0 = arith.constant 0 : i32
    %c0_i32_1 = arith.constant 0 : i32
    return %c0_i32, %c0_i32_0 : i32, i32
  }
  func.func @transform_4(%arg0: i32) -> (i32, i32) {
    %c0_i32 = arith.constant 0 : i32
    %c0_i32_0 = arith.constant 0 : i32
    %c0_i32_1 = arith.constant 0 : i32
    return %c0_i32, %c0_i32_0 : i32, i32
  }
  func.func @transform_5(%arg0: i32) -> (i32, i32) {
    %c0_i32 = arith.constant 0 : i32
    %c0_i32_0 = arith.constant 0 : i32
    %c0_i32_1 = arith.constant 0 : i32
    return %c0_i32, %c0_i32_0 : i32, i32
  }
  func.func @transform_6(%arg0: i32) -> (i32, i32) {
    %c0_i32 = arith.constant 0 : i32
    %c0_i32_0 = arith.constant 0 : i32
    %c0_i32_1 = arith.constant 0 : i32
    return %c0_i32, %c0_i32_0 : i32, i32
  }
  func.func @transform_7(%arg0: i32) -> (i32, i32) {
    %c0_i32 = arith.constant 0 : i32
    %c0_i32_0 = arith.constant 0 : i32
    %c0_i32_1 = arith.constant 0 : i32
    return %c0_i32, %c0_i32_0 : i32, i32
  }
  func.func @transform_8(%arg0: i32) -> (i32, i32) {
    %c0_i32 = arith.constant 0 : i32
    %c0_i32_0 = arith.constant 0 : i32
    return %arg0, %c0_i32 : i32, i32
  }
}

</mosaic_0001>

<bundles_post_ra>
// kernel: tpu_custom_call.1
= control target key start
LH: loop header
LB: loop body
LE: loop exit
PB: predicated region body
PF: predicated region fallthrough
CT: control target
= control target key end

     0   :  { %s1535_s0 = inlined_call_operand.hbm [shape: bf16[16,32], index: 0, kind: input, shape index: {}]   ;;  %s1536_s1 = inlined_call_operand.hbm [shape: bf16[16,32], index: 1, kind: input, shape index: {}]   ;;  %s1537_s2 = inlined_call_operand.hbm [shape: bf16[128,128], index: 2, kind: input, shape index: {}]   ;;  %s1538_s3 = inlined_call_operand.vmem [shape: f32[1,128], index: 3, kind: input, shape index: {}]   ;;  %s1539_s4 = inlined_call_operand.hbm [shape: bf16[128,128], index: 4, kind: input, shape index: {}]   ;;  %s1540_s5 = inlined_call_operand.vmem [shape: f32[1,128], index: 5, kind: input, shape index: {}]   ;;  %s1541_s6 = inlined_call_operand.hbm [shape: bf16[128,128], index: 6, kind: input, shape index: {}]   ;;  %s1542_s7 = inlined_call_operand.vmem [shape: f32[1,128], index: 7, kind: input, shape index: {}]   ;;  %s1543_s8 = inlined_call_operand.hbm [shape: f32[16,128], index: 8, kind: output, shape index: {}]  }
   0x1   :  { %1548 = sst [smem:[#allocation21_spill]] %s1537_s2 }
   0x2   :  { %1549 = sst [smem:[#allocation22_spill]] %s1539_s4 }
   0x3   :  { %1550 = sst [smem:[#allocation23_spill]] %s1541_s6 }
   0x4   :  { %13 = vsyncpa [#allocation3], 0 }
   0x5   :  { %15 = vsyncpa [#allocation3 + $0x1], 0 }
   0x6   :  { %16 = vsyncpa [#allocation6], 0 }
   0x7   :  { %18 = vsyncpa [#allocation6 + $0x1], 0 }
   0x8   :  { %19 = vsyncpa [#allocation9], 0 }
   0x9   :  { %20 = vsyncpa [#allocation4], 0 }
   0xa   :  { %22 = vsyncpa [#allocation4 + $0x1], 0  ;;  %s1340_s27 = smov 0   ;;  %s1342_s28 = smov 0  }
   0xb   :  { %s1344_s29 = smov 0   ;;  %s1346_s30 = smov 0  }
   0xc LB: > { %1551 = sst [smem:[#allocation17_spill]] %s1281_s29  ;;  %s1364_s12 = sadd.s32 4294967295, %s1285_s30   ;;  %s1285_s30 = sphi %s1346_s30, %s1567_s30   ;;  %s1281_s29 = sphi %s1344_s29, %s1569_s29   ;;  %s1277_s28 = sphi %s1342_s28, %s1571_s28   ;;  %s1273_s27 = sphi %s1340_s27, %s1570_s27  }
   0xd   : > { %1552 = sst [smem:[#allocation18_spill]] %s1285_s30  ;;  %p823_p0 = scmp.ge.s32.totalorder %s1285_s30, 1 }
   0xe   : > { %s1553_s2 = sld [smem:[#allocation21_spill]]  ;;  %p49_p1 = scmp.eq.s32.totalorder %s1364_s12, 0 }
   0xf   : > { %p237_p2 = scmp.lt.s32.totalorder %s1285_s30, 3  ;;  %s1287_s14 = smov [#allocation7]  }
  0x10   : > { %s250_s15 = sshll.u32 %s1287_s14, 4  ;;  %s1555_s4 = sld [smem:[#allocation22_spill]]  ;;  %s251_s15 = int_to_ptr.vmem [resolvable:$true] %s250_s15 }
  0x11   : > { %p1369_p3 = pnand %p823_p0, %p237_p2  ;;  %s1557_s6 = sld [smem:[#allocation23_spill]] }
  0x12   : > { %s1288_s23 = smov [#allocation8]   ;;  %s1289_s25 = smov 64  }
  0x13   : > { %p981_p4 = pneg %p1369_p3  ;;  %s267_s24 = sshll.u32 %s1288_s23, 4  ;;  %s268_s24 = int_to_ptr.vmem [resolvable:$true] %s267_s24 }
  0x14   : > { %s248_s11 = sshll.u32 %s1553_s2, 4  ;;  %s1290_s26 = smov 4   ;;  %s249_s11 = int_to_ptr.hbm [resolvable:$true] %s248_s11 }
  0x15   : > { %p1381_p6 = pnand %p981_p4, %p49_p1  ;;  %s1291_s9 = smov [#allocation10]  }
  0x16   : > { %s265_s18 = sshll.u32 %s1555_s4, 4  ;;  %s284_s10 = sshll.u32 %s1291_s9, 4  ;;  %s266_s18 = int_to_ptr.hbm [resolvable:$true] %s265_s18  ;;  %s285_s10 = int_to_ptr.vmem [resolvable:$true] %s284_s10 }
  0x17   : > { %s282_s22 = sshll.u32 %s1557_s6, 4  ;;  %s822_s14 = sadd.s32 4294967294, %s1285_s30   ;;  %s283_s22 = int_to_ptr.hbm [resolvable:$true] %s282_s22 }
  0x18   : > { %984 = dma.hbm_to_vmem [thread:$0]  (!%p1381_p6), %s249_s11, 1024, %s251_s15, [#allocation6], %s1289_s25, %s1289_s25, %s1290_s26  }
  0x19   : > { %987 = dma.hbm_to_vmem [thread:$0]  (!%p1381_p6), %s266_s18, 1024, %s268_s24, [#allocation9], %s1289_s25, %s1289_s25, %s1290_s26  }
  0x1a   : > { %990 = dma.hbm_to_vmem [thread:$0]  (!%p1381_p6), %s283_s22, 1024, %s285_s10, [#allocation9], %s1289_s25, %s1289_s25, %s1290_s26  }
  0x1b   : > { %s1396_s16 = sadd.s32 1, %s1285_s30   ;;  %s35_s17 = sadd.s32 1, %s1281_s29 }
  0x1c   : > { %1558 = sst [smem:[#allocation19_spill]] %s1396_s16  ;;  %s32_s11 = ssub.s32 %s1285_s30, %s1396_s16 }
  0x1d   : > { %p42_p7 = scmp.ne.s32.totalorder %s1281_s29, %s1277_s28  ;;  %p33_p8 = scmp.eq.s32.totalorder %s32_s11, 0 }
  0x1e   : > { %p43_p9 = scmp.eq.s32.totalorder %s1285_s30, 0  ;;  %p48_p10 = scmp.ne.s32.totalorder %s1277_s28, %s1273_s27 }
  0x1f   : > { %p224_p11 = scmp.eq.s32.totalorder %s1364_s12, 1  ;;  %p230_p2 = scmp.eq.s32.totalorder %s822_s14, 1 }
  0x20   : > { %s1408_s15 = scalar_select %p33_p8, %s1281_s29, %s35_s17  }
  0x21   : > { %p1410_p12 = por %p43_p9, %p42_p7  ;;  %p1416_p13 = por %p49_p1, %p48_p10 }
  0x22   : > { %1559 = sst [smem:[#allocation20_spill]] %s1408_s15  ;;  %p1420_p0 = por %p224_p11, %p42_p7 }
  0x23   : > { %p1005_p4 = scmp.lt.s32.totalorder %s1285_s30, 2  ;;  %s301_s21 = sand.u32 1, %s1281_s29  }
  0x24   : > { %p1426_p6 = por %p230_p2, %p48_p10  ;;  %s828_s23 = sshll.u32 %s301_s21, 2 }
  0x25   : > { %s829_s24 = sshll.u32 %s1285_s30, 2  ;;  %s305_s17 = scalar_lea.vmem [#allocation2], %s828_s23 }
  0x26   : > { %s309_s9 = scalar_lea.hbm %s1535_s0, %s829_s24  ;;  %s313_s11 = sshll.u32 %s305_s17, 4  ;;  %s314_s11 = int_to_ptr.vmem [resolvable:$true] %s313_s11 }
  0x27   : > { %s311_s10 = sshll.u32 %s309_s9, 4  ;;  %p1436_p7 = pnand %p1005_p4, %p1410_p12  ;;  %s312_s10 = int_to_ptr.hbm [resolvable:$true] %s311_s10 }
  0x28   : > { %s328_s6 = scalar_lea.hbm %s1536_s1, %s829_s24  ;;  %s320_s15 = sand.u32 1, %s1285_s30  }
  0x29   : > { %s302_s29 = scalar_lea.sflag [#allocation3], %s301_s21  ;;  %s1147_s25 = sshra.s32 %s312_s10, 4  ;;  %s1148_s25 = int_to_ptr.hbm [resolvable:$true] %s1147_s25 }
  0x2a   : > { %s1149_s26 = scalar_lea.hbm %s1148_s25, 4  ;;  %p1151_p9 = pneg %p1436_p7 }
  0x2b   : > { %p1150_p8 = scmp.ne.s32.totalorder %s1148_s25, %s1149_s26  ;;  %s1154_s17 = scalar_lea.hbm %s1535_s0, 8 }
  0x2c   : > { %p1155_p12 = scmp.lt.s32.totalorder %s1148_s25, %s1535_s0  ;;  %p1156_p2 = scmp.lt.s32.totalorder %s1154_s17, %s1149_s26 }
  0x2d   : > { %p1152_p10 = pnand %p1151_p9, %p1150_p8 }
  0x2e   : > { %p1157_p4 = por %p1156_p2, %p1155_p12 }
  0x2f   : > { %p1153_p11 = pneg %p1152_p10 }
  0x31   : > { %p1158_p5 = pnand %p1157_p4, %p1153_p11 }
  0x33   : > { %1161 = shalt.err (!%p1158_p5)
}
  0x34   : > { %994 = dma.hbm_to_vmem [thread:$0]  (!%p1436_p7), %s312_s10, 64, %s314_s11, %s302_s29  }
  0x35   : > { %s330_s21 = sshll.u32 %s328_s6, 4  ;;  %s324_s24 = scalar_lea.vmem [#allocation5], %s828_s23  ;;  %s331_s21 = int_to_ptr.hbm [resolvable:$true] %s330_s21 }
  0x36   : > { %s332_s16 = sshll.u32 %s324_s24, 4  ;;  %s321_s30 = scalar_lea.sflag [#allocation6], %s320_s15  ;;  %s333_s16 = int_to_ptr.vmem [resolvable:$true] %s332_s16 }
  0x37   : > { %s1177_s18 = sshra.s32 %s331_s21, 4  ;;  %s1184_s17 = scalar_lea.hbm %s1536_s1, 8  ;;  %s1178_s18 = int_to_ptr.hbm [resolvable:$true] %s1177_s18 }
  0x38   : > { %s1179_s9 = scalar_lea.hbm %s1178_s18, 4  ;;  %p1185_p5 = scmp.lt.s32.totalorder %s1178_s18, %s1536_s1 }
  0x39   : > { %p1180_p8 = scmp.ne.s32.totalorder %s1178_s18, %s1179_s9  ;;  %p1186_p11 = scmp.lt.s32.totalorder %s1184_s17, %s1179_s9 }
  0x3b   : > { %p1182_p10 = pnand %p1180_p8, %p1151_p9  ;;  %p1187_p2 = por %p1186_p11, %p1185_p5 }
  0x3d   : > { %p1183_p12 = pneg %p1182_p10 }
  0x3f   : > { %p1188_p4 = pnand %p1187_p2, %p1183_p12 }
  0x41   : > { %1191 = shalt.err (!%p1188_p4)
}
  0x42   : > { %997 = dma.hbm_to_vmem [thread:$0]  (!%p1436_p7), %s331_s21, 64, %s333_s16, %s321_s30  }
  0x43   : > { %341 = sbr.rel (%p1369_p3) target bundleno = 624 (0x270), region = 52  ;;  %s1471_s6 = sand.u32 (!%p1369_p3), 1, %s1277_s28  }
  0x44   : > { %s833_s15 = sshll.u32 (!%p1369_p3), %s1471_s6, 2  ;;  %s344_s23 = scalar_lea.sflag (!%p1369_p3), [#allocation3], %s1471_s6 }
  0x45   : > { %s347_s10 = scalar_lea.vmem (!%p1369_p3), [#allocation2], %s833_s15 }
  0x48   : > { %1252 = dma.done.wait (%p1416_p13), %s344_s23, 64  }
  0x49   : > { %1254 = vsyncadd (%p1416_p13), %s344_s23, 4294967232  ;;  %s353_s30 = sand.u32 1, %s1364_s12   ;;  %s357_s13 = scalar_lea.vmem [#allocation5], %s833_s15 }
  0x4a   : > { %s354_s16 = scalar_lea.sflag [#allocation6], %s353_s30 }
  0x4b   : > { %1256 = dma.done.wait (%p1416_p13), %s354_s16, 64  }
  0x4c   : > { %1258 = vsyncadd (%p1416_p13), %s354_s16, 4294967232 }
  0x4d   : > { %1260 = dma.done.wait (%p49_p1), [#allocation6], 1024  }
  0x4e   : > { %1262 = vsyncadd (%p49_p1), [#allocation6], 4294966272 }
  0x4f   : > { %1264 = dma.done.wait (%p49_p1), [#allocation9], 2048  }
  0x50   : > { %1266 = vsyncadd (%p49_p1), [#allocation9], 4294965248  ;;  %v413_v0 = vld [vmem:[%s357_s13] sm:$0xf]  ;;  %v411_v1 = vld [vmem:[%s347_s10] sm:$0xf] }
  0x51   : > { %v946_v2 = vld [vmem:[#allocation7 + $0x38] sm:$0xff]  ;;  %v414_v3 = vunpack.c.l.bf16 %v413_v0  ;;  %v412_v4 = vunpack.c.l.bf16 %v411_v1  ;;  %v945_v5 = vld [vmem:[#allocation7 + $0x30] sm:$0xff]  ;;  %s1292_s19 = smov 32   ;;  %s1293_s11 = smov 96   ;;  %v944_v8 = vld [vmem:[#allocation7 + $0x28] sm:$0xff]  ;;  %vm430_vm0 = vcmask 261120  }
  0x52   : > { %505 = vmatpush.bf16.msra.mxu0 %v946_v2  ;;  %v943_v10 = vld [vmem:[#allocation7 + $0x20] sm:$0xff]  ;;  %s1294_s14 = smov 64   ;;  %v942_v11 = vld [vmem:[#allocation7 + $0x18] sm:$0xff]  ;;  %v941_v12 = vld [vmem:[#allocation7 + $0x10] sm:$0xff]  ;;  %vm432_vm1 = vcmask 523264   ;;  %vm434_vm2 = vcmask 785408  }
  0x53   : > { %419 = vrot.lane.b32.xlu0 %v414_v3, %s1292_s19  ;;  %v415_v6 = vsub.f32 %v412_v4, %v414_v3  ;;  %v417_v7 = vmul.f32 %v414_v3, %v412_v4  ;;  %v940_v13 = vld [vmem:[#allocation7 + $0x8] sm:$0xff]  ;;  %v939_v14 = vld [vmem:[#allocation7] sm:$0xff]  ;;  %v954_v15 = vld [vmem:[#allocation8 + $0x38] sm:$0xff]  ;;  %s936_s9 = sshll.u32 %s1364_s12, 3  ;;  %s838_s25 = sshll.u32 %s1471_s6, 3 }
  0x54   : > { %588 = vmatpush.bf16.msra.mxu1 %v954_v15  ;;  %v953_v16 = vld [vmem:[#allocation8 + $0x30] sm:$0xff]  ;;  %v952_v17 = vld [vmem:[#allocation8 + $0x28] sm:$0xff]  ;;  %v951_v18 = vld [vmem:[#allocation8 + $0x20] sm:$0xff]  ;;  %s696_s2 = scalar_lea.hbm %s1543_s8, %s936_s9  ;;  %s410_s23 = scalar_lea.vmem [#allocation11], %s838_s25 }
  0x55   : > { %427 = vrot.lane.b32.xlu1 %v417_v7, %s1293_s11  ;;  %v416_v9 = vand.u32 2147483647, %v415_v6  ;;  %v950_v19 = vld [vmem:[#allocation8 + $0x18] sm:$0xff]  ;;  %v949_v27 = vld [vmem:[#allocation8 + $0x10] sm:$0xff]  ;;  %v948_v28 = vld [vmem:[#allocation8 + $0x8] sm:$0xff]  ;;  %s698_s10 = sshll.u32 %s410_s23, 4  ;;  %s699_s10 = int_to_ptr.vmem [resolvable:$true] %s698_s10 }
  0x56   : > { %506 = vmatpush.bf16.msra.mxu0 %v945_v5  ;;  %v947_v29 = vld [vmem:[#allocation8] sm:$0xff]  ;;  %v962_v30 = vld [vmem:[#allocation10 + $0x38] sm:$0xff]  ;;  %v961_v31 = vld [vmem:[#allocation10 + $0x30] sm:$0xff]  ;;  %s700_s30 = sshll.u32 %s696_s2, 4  ;;  %s686_s16 = scalar_lea.sflag [#allocation4], %s1471_s6  ;;  %s701_s30 = int_to_ptr.hbm [resolvable:$true] %s700_s30 }
  0x57   : > { %671 = vmatpush.bf16.msra.mxu2 %v962_v30  ;;  %v960_v32 = vld [vmem:[#allocation10 + $0x28] sm:$0xff]  ;;  %v959_v33 = vld [vmem:[#allocation10 + $0x20] sm:$0xff]  ;;  %v958_v34 = vld [vmem:[#allocation10 + $0x18] sm:$0xff]  ;;  %s1221_s12 = sshra.s32 %s701_s30, 4  ;;  %s1222_s12 = int_to_ptr.hbm [resolvable:$true] %s1221_s12 }
  0x58   : > { %589 = vmatpush.bf16.msra.mxu1 %v953_v16  ;;  %v1050_v35 = vld [vmem:[%s1538_s3] ss:$0 sm:$0xff]  ;;  %v956_v42 = vld [vmem:[#allocation10 + $0x8] sm:$0xff]  ;;  %v955_v43 = vld [vmem:[#allocation10] sm:$0xff]  ;;  %s1223_s13 = scalar_lea.hbm %s1222_s12, 8  ;;  %p1228_p7 = scmp.lt.s32.totalorder %s1222_s12, %s1543_s8 }
  0x59   : > { %v957_v41 = vld [vmem:[#allocation10 + $0x10] sm:$0xff]  ;;  %p1224_p1 = scmp.ne.s32.totalorder %s1222_s12, %s1223_s13 }
  0x5a   : > { %507 = vmatpush.bf16.msra.mxu0 %v944_v8  ;;  %v1051_v44 = vld [vmem:[%s1540_s5] ss:$0 sm:$0xff] }
  0x5b   : > { %423 = vrot.lane.b32.xlu0 %v416_v9, %s1294_s14  ;;  %672 = vmatpush.bf16.msra.mxu2 %v961_v31  ;;  %v1052_v50 = vld [vmem:[%s1542_s7] ss:$0 sm:$0xff]  ;;  %p1225_p3 = pnand %p1224_p1, %p1420_p0  ;;  %s1227_s14 = scalar_lea.hbm %s1543_s8, 16 }
  0x5c   : > { %590 = vmatpush.bf16.msra.mxu1 %v952_v17  ;;  %p1229_p9 = scmp.lt.s32.totalorder %s1227_s14, %s1223_s13 }
  0x5d   : > { %p1226_p13 = pneg %p1225_p3 }
  0x5e   : > { %508 = vmatpush.bf16.msra.mxu0 %v943_v10  ;;  %p1230_p8 = por %p1229_p9, %p1228_p7 }
  0x5f   : > { %673 = vmatpush.bf16.msra.mxu2 %v960_v32 }
  0x60   : > { %591 = vmatpush.bf16.msra.mxu1 %v951_v18  ;;  %p1231_p10 = pnand %p1230_p8, %p1226_p13 }
  0x62   : > { %509 = vmatpush.bf16.msra.mxu0 %v942_v11 }
  0x63   : > { %674 = vmatpush.bf16.msra.mxu2 %v959_v33 }
  0x64   : > { %592 = vmatpush.bf16.msra.mxu1 %v950_v19 }
  0x66   : > { %510 = vmatpush.bf16.msra.mxu0 %v941_v12 }
  0x67   : > { %675 = vmatpush.bf16.msra.mxu2 %v958_v34 }
  0x68   : > { %593 = vmatpush.bf16.msra.mxu1 %v949_v27 }
  0x6a   : > { %511 = vmatpush.bf16.msra.mxu0 %v940_v13 }
  0x6b   : > { %676 = vmatpush.bf16.msra.mxu2 %v957_v41 }
  0x6c   : > { %594 = vmatpush.bf16.msra.mxu1 %v948_v28 }
  0x6e   : > { %512 = vmatpush.bf16.msra.mxu0 %v939_v14 }
  0x6f   : > { %677 = vmatpush.bf16.msra.mxu2 %v956_v42 }
  0x70   : > { %595 = vmatpush.bf16.msra.mxu1 %v947_v29 }
  0x73   : > { %678 = vmatpush.bf16.msra.mxu2 %v955_v43 }
  0xc5   : > { %v420_v20 = vpop.permute.xlu0 %419 }
  0xc6   : > { %v431_v22 = vsel %vm430_vm0, %v412_v4, %v420_v20 }
  0xc7   : > { %v428_v21 = vpop.permute.xlu1 %427 }
  0xcd   : > { %v424_v23 = vpop.permute.xlu0 %423 }
  0xce   : > { %v433_v24 = vsel %vm432_vm1, %v431_v22, %v424_v23 }
  0xcf   : > { %v435_v25 = vsel %vm434_vm2, %v433_v24, %v428_v21 }
  0xd0   : > { %v436_v26 = vpack.c.bf16 %v435_v25, %v435_v25 }
  0xd2   : > { %513 = vmatmul.bf16.vlgmr.msra.gmra.mxu0 %v436_v26 }
 0x14f   : > { %v514_v36 = vpop.f32.mrf.mxu0 }
 0x150   : > { %v515_v37 = vadd.f32 %v1050_v35, %v514_v36 }
 0x152   : > { %1053 = vtanh.f32 %v515_v37 }
 0x157   : > { %v516_v38 = vpop.f32.mrf.mxu0 }
 0x158   : > { %v1054_v39 = vpop.eup %1053 }
 0x159   : > { %v519_v40 = vpack.c.bf16 %v1054_v39, %v1054_v39 }
 0x15b   : > { %596 = vmatmul.bf16.vlgmr.msra.gmra.mxu1 %v519_v40 }
 0x1d8   : > { %v597_v45 = vpop.f32.mrf.mxu1 }
 0x1d9   : > { %v598_v46 = vadd.f32 %v1051_v44, %v597_v45 }
 0x1db   : > { %1055 = vtanh.f32 %v598_v46 }
 0x1e0   : > { %v599_v47 = vpop.f32.mrf.mxu1 }
 0x1e1   : > { %v1056_v48 = vpop.eup %1055 }
 0x1e2   : > { %v602_v49 = vpack.c.bf16 %v1056_v48, %v1056_v48 }
 0x1e4   : > { %679 = vmatmul.bf16.vlgmr.msra.gmra.mxu2 %v602_v49 }
 0x267   : > { %v680_v51 = vpop.f32.mrf.mxu2 }
 0x268   : > { %v681_v52 = vadd.f32 %v1052_v50, %v680_v51 }
 0x26a   : > { %684 = vst [vmem:[%s410_s23] sm:$0xff] %v681_v52 }
 0x26b   : > { %1234 = shalt.err (!%p1231_p10)
}
 0x26c   : > { %979 = dma.vmem_to_hbm [thread:$0]  (%p1420_p0), %s699_s10, 128, %s701_s30, %s686_s16  }
 0x26f   : > { %v682_v53 = vpop.f32.mrf.mxu2 }
 0x270 PF: > { %s1565_s6 = sld [smem:[#allocation18_spill]]  ;;  %s712_s24 = sand.u32 1, %s1273_s27  }
 0x271   : > { %s713_s18 = scalar_lea.sflag [#allocation4], %s712_s24 }
 0x276   : > { %p1566_p12 = scmp.ge.s32.totalorder %s1565_s6, 2 }
 0x278   : > { %p999_p5 = pnand %p1566_p12, %p1426_p6 }
 0x27a   : > { %p1000_p11 = pneg %p999_p5 }
 0x27c   : > { %1268 = dma.done.wait (%p1000_p11), %s713_s18, 128  }
 0x27d   : > { %1270 = vsyncadd (%p1000_p11), %s713_s18, 4294967168  ;;  %s1567_s30 = sld [smem:[#allocation19_spill]]  ;;  %s1570_s27 = smov %s1277_s28 }
 0x27e   : > { %s1568_s9 = sld [smem:[#allocation17_spill]] }
 0x27f   : > { %s1569_s29 = sld [smem:[#allocation20_spill]] }
 0x283   : > { %p25_p2 = scmp.ge.s32.totalorder %s1567_s30, 4  }
 0x284   : > { %s1571_s28 = smov %s1568_s9 }
 0x285   :  { %27 = sbr.rel (!%p25_p2) target bundleno = 12 (0xc), region = 122 }
 0x28a   :  { %719 = vsyncpa [#allocation3], 1 }
 0x28b   :  { %721 = vsyncpa [#allocation3 + $0x1], 1 }
 0x28c   :  { %722 = vsyncpa [#allocation6], 1 }
 0x28d   :  { %724 = vsyncpa [#allocation6 + $0x1], 1 }
 0x28e   :  { %725 = vsyncpa [#allocation9], 1 }
 0x28f   :  { %726 = vsyncpa [#allocation4], 1 }
 0x290   :  { %728 = vsyncpa [#allocation4 + $0x1], 1 }

// kernel: tpu_custom_call.1
= control target key start
LH: loop header
LB: loop body
LE: loop exit
PB: predicated region body
PF: predicated region fallthrough
CT: control target
= control target key end

     0   :  { %s1535_s0 = inlined_call_operand.hbm [shape: bf16[16,32], index: 0, kind: input, shape index: {}]   ;;  %s1536_s1 = inlined_call_operand.hbm [shape: bf16[16,32], index: 1, kind: input, shape index: {}]   ;;  %s1537_s2 = inlined_call_operand.hbm [shape: bf16[128,128], index: 2, kind: input, shape index: {}]   ;;  %s1538_s3 = inlined_call_operand.vmem [shape: f32[1,128], index: 3, kind: input, shape index: {}]   ;;  %s1539_s4 = inlined_call_operand.hbm [shape: bf16[128,128], index: 4, kind: input, shape index: {}]   ;;  %s1540_s5 = inlined_call_operand.vmem [shape: f32[1,128], index: 5, kind: input, shape index: {}]   ;;  %s1541_s6 = inlined_call_operand.hbm [shape: bf16[128,128], index: 6, kind: input, shape index: {}]   ;;  %s1542_s7 = inlined_call_operand.vmem [shape: f32[1,128], index: 7, kind: input, shape index: {}]   ;;  %s1543_s8 = inlined_call_operand.hbm [shape: f32[16,128], index: 8, kind: output, shape index: {}]  }
   0x1   :  { %1548 = sst [smem:[#allocation21_spill]] %s1537_s2 }
   0x2   :  { %1549 = sst [smem:[#allocation22_spill]] %s1539_s4 }
   0x3   :  { %1550 = sst [smem:[#allocation23_spill]] %s1541_s6 }
   0x4   :  { %13 = vsyncpa [#allocation3], 0 }
   0x5   :  { %15 = vsyncpa [#allocation3 + $0x1], 0 }
   0x6   :  { %16 = vsyncpa [#allocation6], 0 }
   0x7   :  { %18 = vsyncpa [#allocation6 + $0x1], 0 }
   0x8   :  { %19 = vsyncpa [#allocation9], 0 }
   0x9   :  { %20 = vsyncpa [#allocation4], 0 }
   0xa   :  { %22 = vsyncpa [#allocation4 + $0x1], 0  ;;  %s1340_s27 = smov 0   ;;  %s1342_s28 = smov 0  }
   0xb   :  { %s1344_s29 = smov 0   ;;  %s1346_s30 = smov 0  }
   0xc LB: > { %1551 = sst [smem:[#allocation17_spill]] %s1281_s29  ;;  %s1364_s12 = sadd.s32 4294967295, %s1285_s30   ;;  %s1285_s30 = sphi %s1346_s30, %s1567_s30   ;;  %s1281_s29 = sphi %s1344_s29, %s1569_s29   ;;  %s1277_s28 = sphi %s1342_s28, %s1571_s28   ;;  %s1273_s27 = sphi %s1340_s27, %s1570_s27  }
   0xd   : > { %1552 = sst [smem:[#allocation18_spill]] %s1285_s30  ;;  %p823_p0 = scmp.ge.s32.totalorder %s1285_s30, 1 }
   0xe   : > { %s1553_s2 = sld [smem:[#allocation21_spill]]  ;;  %p49_p1 = scmp.eq.s32.totalorder %s1364_s12, 0 }
   0xf   : > { %p237_p2 = scmp.lt.s32.totalorder %s1285_s30, 3  ;;  %s1287_s14 = smov [#allocation7]  }
  0x10   : > { %s250_s15 = sshll.u32 %s1287_s14, 4  ;;  %s1555_s4 = sld [smem:[#allocation22_spill]]  ;;  %s251_s15 = int_to_ptr.vmem [resolvable:$true] %s250_s15 }
  0x11   : > { %p1369_p3 = pnand %p823_p0, %p237_p2  ;;  %s1557_s6 = sld [smem:[#allocation23_spill]] }
  0x12   : > { %s1288_s23 = smov [#allocation8]   ;;  %s1289_s25 = smov 64  }
  0x13   : > { %p981_p4 = pneg %p1369_p3  ;;  %s267_s24 = sshll.u32 %s1288_s23, 4  ;;  %s268_s24 = int_to_ptr.vmem [resolvable:$true] %s267_s24 }
  0x14   : > { %s248_s11 = sshll.u32 %s1553_s2, 4  ;;  %s1290_s26 = smov 4   ;;  %s249_s11 = int_to_ptr.hbm [resolvable:$true] %s248_s11 }
  0x15   : > { %p1381_p6 = pnand %p981_p4, %p49_p1  ;;  %s1291_s9 = smov [#allocation10]  }
  0x16   : > { %s265_s18 = sshll.u32 %s1555_s4, 4  ;;  %s284_s10 = sshll.u32 %s1291_s9, 4  ;;  %s266_s18 = int_to_ptr.hbm [resolvable:$true] %s265_s18  ;;  %s285_s10 = int_to_ptr.vmem [resolvable:$true] %s284_s10 }
  0x17   : > { %s282_s22 = sshll.u32 %s1557_s6, 4  ;;  %s822_s14 = sadd.s32 4294967294, %s1285_s30   ;;  %s283_s22 = int_to_ptr.hbm [resolvable:$true] %s282_s22 }
  0x18   : > { %984 = dma.hbm_to_vmem [thread:$0]  (!%p1381_p6), %s249_s11, 1024, %s251_s15, [#allocation6], %s1289_s25, %s1289_s25, %s1290_s26  }
  0x19   : > { %987 = dma.hbm_to_vmem [thread:$0]  (!%p1381_p6), %s266_s18, 1024, %s268_s24, [#allocation9], %s1289_s25, %s1289_s25, %s1290_s26  }
  0x1a   : > { %990 = dma.hbm_to_vmem [thread:$0]  (!%p1381_p6), %s283_s22, 1024, %s285_s10, [#allocation9], %s1289_s25, %s1289_s25, %s1290_s26  }
  0x1b   : > { %s1396_s16 = sadd.s32 1, %s1285_s30   ;;  %s35_s17 = sadd.s32 1, %s1281_s29 }
  0x1c   : > { %1558 = sst [smem:[#allocation19_spill]] %s1396_s16  ;;  %s32_s11 = ssub.s32 %s1285_s30, %s1396_s16 }
  0x1d   : > { %p42_p7 = scmp.ne.s32.totalorder %s1281_s29, %s1277_s28  ;;  %p33_p8 = scmp.eq.s32.totalorder %s32_s11, 0 }
  0x1e   : > { %p43_p9 = scmp.eq.s32.totalorder %s1285_s30, 0  ;;  %p48_p10 = scmp.ne.s32.totalorder %s1277_s28, %s1273_s27 }
  0x1f   : > { %p224_p11 = scmp.eq.s32.totalorder %s1364_s12, 1  ;;  %p230_p2 = scmp.eq.s32.totalorder %s822_s14, 1 }
  0x20   : > { %s1408_s15 = scalar_select %p33_p8, %s1281_s29, %s35_s17  }
  0x21   : > { %p1410_p12 = por %p43_p9, %p42_p7  ;;  %p1416_p13 = por %p49_p1, %p48_p10 }
  0x22   : > { %1559 = sst [smem:[#allocation20_spill]] %s1408_s15  ;;  %p1420_p0 = por %p224_p11, %p42_p7 }
  0x23   : > { %p1005_p4 = scmp.lt.s32.totalorder %s1285_s30, 2  ;;  %s301_s21 = sand.u32 1, %s1281_s29  }
  0x24   : > { %p1426_p6 = por %p230_p2, %p48_p10  ;;  %s828_s23 = sshll.u32 %s301_s21, 2 }
  0x25   : > { %s829_s24 = sshll.u32 %s1285_s30, 2  ;;  %s305_s17 = scalar_lea.vmem [#allocation2], %s828_s23 }
  0x26   : > { %s309_s9 = scalar_lea.hbm %s1535_s0, %s829_s24  ;;  %s313_s11 = sshll.u32 %s305_s17, 4  ;;  %s314_s11 = int_to_ptr.vmem [resolvable:$true] %s313_s11 }
  0x27   : > { %s311_s10 = sshll.u32 %s309_s9, 4  ;;  %p1436_p7 = pnand %p1005_p4, %p1410_p12  ;;  %s312_s10 = int_to_ptr.hbm [resolvable:$true] %s311_s10 }
  0x28   : > { %s328_s6 = scalar_lea.hbm %s1536_s1, %s829_s24  ;;  %s320_s15 = sand.u32 1, %s1285_s30  }
  0x29   : > { %s302_s29 = scalar_lea.sflag [#allocation3], %s301_s21  ;;  %s1147_s25 = sshra.s32 %s312_s10, 4  ;;  %s1148_s25 = int_to_ptr.hbm [resolvable:$true] %s1147_s25 }
  0x2a   : > { %s1149_s26 = scalar_lea.hbm %s1148_s25, 4  ;;  %p1151_p9 = pneg %p1436_p7 }
  0x2b   : > { %p1150_p8 = scmp.ne.s32.totalorder %s1148_s25, %s1149_s26  ;;  %s1154_s17 = scalar_lea.hbm %s1535_s0, 8 }
  0x2c   : > { %p1155_p12 = scmp.lt.s32.totalorder %s1148_s25, %s1535_s0  ;;  %p1156_p2 = scmp.lt.s32.totalorder %s1154_s17, %s1149_s26 }
  0x2d   : > { %p1152_p10 = pnand %p1151_p9, %p1150_p8 }
  0x2e   : > { %p1157_p4 = por %p1156_p2, %p1155_p12 }
  0x2f   : > { %p1153_p11 = pneg %p1152_p10 }
  0x31   : > { %p1158_p5 = pnand %p1157_p4, %p1153_p11 }
  0x33   : > { %1161 = shalt.err (!%p1158_p5)
}
  0x34   : > { %994 = dma.hbm_to_vmem [thread:$0]  (!%p1436_p7), %s312_s10, 64, %s314_s11, %s302_s29  }
  0x35   : > { %s330_s21 = sshll.u32 %s328_s6, 4  ;;  %s324_s24 = scalar_lea.vmem [#allocation5], %s828_s23  ;;  %s331_s21 = int_to_ptr.hbm [resolvable:$true] %s330_s21 }
  0x36   : > { %s332_s16 = sshll.u32 %s324_s24, 4  ;;  %s321_s30 = scalar_lea.sflag [#allocation6], %s320_s15  ;;  %s333_s16 = int_to_ptr.vmem [resolvable:$true] %s332_s16 }
  0x37   : > { %s1177_s18 = sshra.s32 %s331_s21, 4  ;;  %s1184_s17 = scalar_lea.hbm %s1536_s1, 8  ;;  %s1178_s18 = int_to_ptr.hbm [resolvable:$true] %s1177_s18 }
  0x38   : > { %s1179_s9 = scalar_lea.hbm %s1178_s18, 4  ;;  %p1185_p5 = scmp.lt.s32.totalorder %s1178_s18, %s1536_s1 }
  0x39   : > { %p1180_p8 = scmp.ne.s32.totalorder %s1178_s18, %s1179_s9  ;;  %p1186_p11 = scmp.lt.s32.totalorder %s1184_s17, %s1179_s9 }
  0x3b   : > { %p1182_p10 = pnand %p1180_p8, %p1151_p9  ;;  %p1187_p2 = por %p1186_p11, %p1185_p5 }
  0x3d   : > { %p1183_p12 = pneg %p1182_p10 }
  0x3f   : > { %p1188_p4 = pnand %p1187_p2, %p1183_p12 }
  0x41   : > { %1191 = shalt.err (!%p1188_p4)
}
  0x42   : > { %997 = dma.hbm_to_vmem [thread:$0]  (!%p1436_p7), %s331_s21, 64, %s333_s16, %s321_s30  }
  0x43   : > { %341 = sbr.rel (%p1369_p3) target bundleno = 624 (0x270), region = 52  ;;  %s1471_s6 = sand.u32 (!%p1369_p3), 1, %s1277_s28  }
  0x44   : > { %s833_s15 = sshll.u32 (!%p1369_p3), %s1471_s6, 2  ;;  %s344_s23 = scalar_lea.sflag (!%p1369_p3), [#allocation3], %s1471_s6 }
  0x45   : > { %s347_s10 = scalar_lea.vmem (!%p1369_p3), [#allocation2], %s833_s15 }
  0x48   : > { %1252 = dma.done.wait (%p1416_p13), %s344_s23, 64  }
  0x49   : > { %1254 = vsyncadd (%p1416_p13), %s344_s23, 4294967232  ;;  %s353_s30 = sand.u32 1, %s1364_s12   ;;  %s357_s13 = scalar_lea.vmem [#allocation5], %s833_s15 }
  0x4a   : > { %s354_s16 = scalar_lea.sflag [#allocation6], %s353_s30 }
  0x4b   : > { %1256 = dma.done.wait (%p1416_p13), %s354_s16, 64  }
  0x4c   : > { %1258 = vsyncadd (%p1416_p13), %s354_s16, 4294967232 }
  0x4d   : > { %1260 = dma.done.wait (%p49_p1), [#allocation6], 1024  }
  0x4e   : > { %1262 = vsyncadd (%p49_p1), [#allocation6], 4294966272 }
  0x4f   : > { %1264 = dma.done.wait (%p49_p1), [#allocation9], 2048  }
  0x50   : > { %1266 = vsyncadd (%p49_p1), [#allocation9], 4294965248  ;;  %v413_v0 = vld [vmem:[%s357_s13] sm:$0xf]  ;;  %v411_v1 = vld [vmem:[%s347_s10] sm:$0xf] }
  0x51   : > { %v946_v2 = vld [vmem:[#allocation7 + $0x38] sm:$0xff]  ;;  %v414_v3 = vunpack.c.l.bf16 %v413_v0  ;;  %v412_v4 = vunpack.c.l.bf16 %v411_v1  ;;  %v945_v5 = vld [vmem:[#allocation7 + $0x30] sm:$0xff]  ;;  %s1292_s19 = smov 32   ;;  %s1293_s11 = smov 96   ;;  %v944_v8 = vld [vmem:[#allocation7 + $0x28] sm:$0xff]  ;;  %vm430_vm0 = vcmask 261120  }
  0x52   : > { %505 = vmatpush.bf16.msra.mxu0 %v946_v2  ;;  %v943_v10 = vld [vmem:[#allocation7 + $0x20] sm:$0xff]  ;;  %s1294_s14 = smov 64   ;;  %v942_v11 = vld [vmem:[#allocation7 + $0x18] sm:$0xff]  ;;  %v941_v12 = vld [vmem:[#allocation7 + $0x10] sm:$0xff]  ;;  %vm432_vm1 = vcmask 523264   ;;  %vm434_vm2 = vcmask 785408  }
  0x53   : > { %419 = vrot.lane.b32.xlu0 %v414_v3, %s1292_s19  ;;  %v415_v6 = vsub.f32 %v412_v4, %v414_v3  ;;  %v417_v7 = vmul.f32 %v414_v3, %v412_v4  ;;  %v940_v13 = vld [vmem:[#allocation7 + $0x8] sm:$0xff]  ;;  %v939_v14 = vld [vmem:[#allocation7] sm:$0xff]  ;;  %v954_v15 = vld [vmem:[#allocation8 + $0x38] sm:$0xff]  ;;  %s936_s9 = sshll.u32 %s1364_s12, 3  ;;  %s838_s25 = sshll.u32 %s1471_s6, 3 }
  0x54   : > { %588 = vmatpush.bf16.msra.mxu1 %v954_v15  ;;  %v953_v16 = vld [vmem:[#allocation8 + $0x30] sm:$0xff]  ;;  %v952_v17 = vld [vmem:[#allocation8 + $0x28] sm:$0xff]  ;;  %v951_v18 = vld [vmem:[#allocation8 + $0x20] sm:$0xff]  ;;  %s696_s2 = scalar_lea.hbm %s1543_s8, %s936_s9  ;;  %s410_s23 = scalar_lea.vmem [#allocation11], %s838_s25 }
  0x55   : > { %427 = vrot.lane.b32.xlu1 %v417_v7, %s1293_s11  ;;  %v416_v9 = vand.u32 2147483647, %v415_v6  ;;  %v950_v19 = vld [vmem:[#allocation8 + $0x18] sm:$0xff]  ;;  %v949_v27 = vld [vmem:[#allocation8 + $0x10] sm:$0xff]  ;;  %v948_v28 = vld [vmem:[#allocation8 + $0x8] sm:$0xff]  ;;  %s698_s10 = sshll.u32 %s410_s23, 4  ;;  %s699_s10 = int_to_ptr.vmem [resolvable:$true] %s698_s10 }
  0x56   : > { %506 = vmatpush.bf16.msra.mxu0 %v945_v5  ;;  %v947_v29 = vld [vmem:[#allocation8] sm:$0xff]  ;;  %v962_v30 = vld [vmem:[#allocation10 + $0x38] sm:$0xff]  ;;  %v961_v31 = vld [vmem:[#allocation10 + $0x30] sm:$0xff]  ;;  %s700_s30 = sshll.u32 %s696_s2, 4  ;;  %s686_s16 = scalar_lea.sflag [#allocation4], %s1471_s6  ;;  %s701_s30 = int_to_ptr.hbm [resolvable:$true] %s700_s30 }
  0x57   : > { %671 = vmatpush.bf16.msra.mxu2 %v962_v30  ;;  %v960_v32 = vld [vmem:[#allocation10 + $0x28] sm:$0xff]  ;;  %v959_v33 = vld [vmem:[#allocation10 + $0x20] sm:$0xff]  ;;  %v958_v34 = vld [vmem:[#allocation10 + $0x18] sm:$0xff]  ;;  %s1221_s12 = sshra.s32 %s701_s30, 4  ;;  %s1222_s12 = int_to_ptr.hbm [resolvable:$true] %s1221_s12 }
  0x58   : > { %589 = vmatpush.bf16.msra.mxu1 %v953_v16  ;;  %v1050_v35 = vld [vmem:[%s1538_s3] ss:$0 sm:$0xff]  ;;  %v956_v42 = vld [vmem:[#allocation10 + $0x8] sm:$0xff]  ;;  %v955_v43 = vld [vmem:[#allocation10] sm:$0xff]  ;;  %s1223_s13 = scalar_lea.hbm %s1222_s12, 8  ;;  %p1228_p7 = scmp.lt.s32.totalorder %s1222_s12, %s1543_s8 }
  0x59   : > { %v957_v41 = vld [vmem:[#allocation10 + $0x10] sm:$0xff]  ;;  %p1224_p1 = scmp.ne.s32.totalorder %s1222_s12, %s1223_s13 }
  0x5a   : > { %507 = vmatpush.bf16.msra.mxu0 %v944_v8  ;;  %v1051_v44 = vld [vmem:[%s1540_s5] ss:$0 sm:$0xff] }
  0x5b   : > { %423 = vrot.lane.b32.xlu0 %v416_v9, %s1294_s14  ;;  %672 = vmatpush.bf16.msra.mxu2 %v961_v31  ;;  %v1052_v50 = vld [vmem:[%s1542_s7] ss:$0 sm:$0xff]  ;;  %p1225_p3 = pnand %p1224_p1, %p1420_p0  ;;  %s1227_s14 = scalar_lea.hbm %s1543_s8, 16 }
  0x5c   : > { %590 = vmatpush.bf16.msra.mxu1 %v952_v17  ;;  %p1229_p9 = scmp.lt.s32.totalorder %s1227_s14, %s1223_s13 }
  0x5d   : > { %p1226_p13 = pneg %p1225_p3 }
  0x5e   : > { %508 = vmatpush.bf16.msra.mxu0 %v943_v10  ;;  %p1230_p8 = por %p1229_p9, %p1228_p7 }
  0x5f   : > { %673 = vmatpush.bf16.msra.mxu2 %v960_v32 }
  0x60   : > { %591 = vmatpush.bf16.msra.mxu1 %v951_v18  ;;  %p1231_p10 = pnand %p1230_p8, %p1226_p13 }
  0x62   : > { %509 = vmatpush.bf16.msra.mxu0 %v942_v11 }
  0x63   : > { %674 = vmatpush.bf16.msra.mxu2 %v959_v33 }
  0x64   : > { %592 = vmatpush.bf16.msra.mxu1 %v950_v19 }
  0x66   : > { %510 = vmatpush.bf16.msra.mxu0 %v941_v12 }
  0x67   : > { %675 = vmatpush.bf16.msra.mxu2 %v958_v34 }
  0x68   : > { %593 = vmatpush.bf16.msra.mxu1 %v949_v27 }
  0x6a   : > { %511 = vmatpush.bf16.msra.mxu0 %v940_v13 }
  0x6b   : > { %676 = vmatpush.bf16.msra.mxu2 %v957_v41 }
  0x6c   : > { %594 = vmatpush.bf16.msra.mxu1 %v948_v28 }
  0x6e   : > { %512 = vmatpush.bf16.msra.mxu0 %v939_v14 }
  0x6f   : > { %677 = vmatpush.bf16.msra.mxu2 %v956_v42 }
  0x70   : > { %595 = vmatpush.bf16.msra.mxu1 %v947_v29 }
  0x73   : > { %678 = vmatpush.bf16.msra.mxu2 %v955_v43 }
  0xc5   : > { %v420_v20 = vpop.permute.xlu0 %419 }
  0xc6   : > { %v431_v22 = vsel %vm430_vm0, %v412_v4, %v420_v20 }
  0xc7   : > { %v428_v21 = vpop.permute.xlu1 %427 }
  0xcd   : > { %v424_v23 = vpop.permute.xlu0 %423 }
  0xce   : > { %v433_v24 = vsel %vm432_vm1, %v431_v22, %v424_v23 }
  0xcf   : > { %v435_v25 = vsel %vm434_vm2, %v433_v24, %v428_v21 }
  0xd0   : > { %v436_v26 = vpack.c.bf16 %v435_v25, %v435_v25 }
  0xd2   : > { %513 = vmatmul.bf16.vlgmr.msra.gmra.mxu0 %v436_v26 }
 0x14f   : > { %v514_v36 = vpop.f32.mrf.mxu0 }
 0x150   : > { %v515_v37 = vadd.f32 %v1050_v35, %v514_v36 }
 0x152   : > { %1053 = vtanh.f32 %v515_v37 }
 0x157   : > { %v516_v38 = vpop.f32.mrf.mxu0 }
 0x158   : > { %v1054_v39 = vpop.eup %1053 }
 0x159   : > { %v519_v40 = vpack.c.bf16 %v1054_v39, %v1054_v39 }
 0x15b   : > { %596 = vmatmul.bf16.vlgmr.msra.gmra.mxu1 %v519_v40 }
 0x1d8   : > { %v597_v45 = vpop.f32.mrf.mxu1 }
 0x1d9   : > { %v598_v46 = vadd.f32 %v1051_v44, %v597_v45 }
 0x1db   : > { %1055 = vtanh.f32 %v598_v46 }
 0x1e0   : > { %v599_v47 = vpop.f32.mrf.mxu1 }
 0x1e1   : > { %v1056_v48 = vpop.eup %1055 }
 0x1e2   : > { %v602_v49 = vpack.c.bf16 %v1056_v48, %v1056_v48 }
 0x1e4   : > { %679 = vmatmul.bf16.vlgmr.msra.gmra.mxu2 %v602_v49 }
 0x267   : > { %v680_v51 = vpop.f32.mrf.mxu2 }
 0x268   : > { %v681_v52 = vadd.f32 %v1052_v50, %v680_v51 }
 0x26a   : > { %684 = vst [vmem:[%s410_s23] sm:$0xff] %v681_v52 }
 0x26b   : > { %1234 = shalt.err (!%p1231_p10)
}
 0x26c   : > { %979 = dma.vmem_to_hbm [thread:$0]  (%p1420_p0), %s699_s10, 128, %s701_s30, %s686_s16  }
 0x26f   : > { %v682_v53 = vpop.f32.mrf.mxu2 }
 0x270 PF: > { %s1565_s6 = sld [smem:[#allocation18_spill]]  ;;  %s712_s24 = sand.u32 1, %s1273_s27  }
 0x271   : > { %s713_s18 = scalar_lea.sflag [#allocation4], %s712_s24 }
 0x276   : > { %p1566_p12 = scmp.ge.s32.totalorder %s1565_s6, 2 }
 0x278   : > { %p999_p5 = pnand %p1566_p12, %p1426_p6 }
 0x27a   : > { %p1000_p11 = pneg %p999_p5 }
 0x27c   : > { %1268 = dma.done.wait (%p1000_p11), %s713_s18, 128  }
 0x27d   : > { %1270 = vsyncadd (%p1000_p11), %s713_s18, 4294967168  ;;  %s1567_s30 = sld [smem:[#allocation19_spill]]  ;;  %s1570_s27 = smov %s1277_s28 }
 0x27e   : > { %s1568_s9 = sld [smem:[#allocation17_spill]] }
 0x27f   : > { %s1569_s29 = sld [smem:[#allocation20_spill]] }
 0x283   : > { %p25_p2 = scmp.ge.s32.totalorder %s1567_s30, 4  }
 0x284   : > { %s1571_s28 = smov %s1568_s9 }
 0x285   :  { %27 = sbr.rel (!%p25_p2) target bundleno = 12 (0xc), region = 122 }
 0x28a   :  { %719 = vsyncpa [#allocation3], 1 }
 0x28b   :  { %721 = vsyncpa [#allocation3 + $0x1], 1 }
 0x28c   :  { %722 = vsyncpa [#allocation6], 1 }
 0x28d   :  { %724 = vsyncpa [#allocation6 + $0x1], 1 }
 0x28e   :  { %725 = vsyncpa [#allocation9], 1 }
 0x28f   :  { %726 = vsyncpa [#allocation4], 1 }
 0x290   :  { %728 = vsyncpa [#allocation4 + $0x1], 1 }

</bundles_post_ra>
